<compile_context>
chip_gen: v7x
topology: tpu7x:2x2x1
jax: 0.10.0
libtpu: 0.0.40
codegen_flags: <defaults>
</compile_context>

<pallas_src>
from functools import lru_cache, partial

import numpy as np
import jax
import jax.numpy as jnp
from jax.experimental import pallas as pl
from jax.experimental.pallas import tpu as pltpu


def _embed_kernel(x_ref, pw_ref, phc_ref, wk_ref, b_ref, o_ref):
    # x_ref:   (1, C*H, W)     rows are (c, h), cols are w   (free NCHW view)
    # pw_ref:  (W, Wp)         width pooling, scaled by 1/r
    # phc_ref: (C*Hp, C*H)     I_C (x) Ph : height pooling, scaled by 1/r
    # wk_ref:  (E*Hp, C*Hp)    kron(weight, I_Hp) : 1x1 conv on pooled rows
    # b_ref:   (E*Hp, 1)       bias repeated over Hp rows
    # o_ref:   (1, E*Hp, Wp)   rows are (e, hp), cols are wp (free NCHW view)
    x = x_ref[0]                                                  # (C*H, W)
    a = jnp.dot(x, pw_ref[...],
                preferred_element_type=jnp.float32)               # pool W -> (C*H, Wp)
    p = jnp.dot(phc_ref[...], a,
                preferred_element_type=jnp.float32)               # pool H -> (C*Hp, Wp)
    o = jnp.dot(wk_ref[...], p,
                preferred_element_type=jnp.float32) + b_ref[...]  # 1x1 conv + bias
    o_ref[0] = o.astype(o_ref.dtype)


@lru_cache(maxsize=None)
def _pool_constants(C, H, W, r):
    """Small separable pooling matrices, built once per (C, H, W, r)."""
    Hp, Wp = H // r, W // r
    # Ph[hp, h] = 1/r  if h // r == hp      (Hp, H)
    ph = (np.arange(H)[None, :] // r == np.arange(Hp)[:, None]).astype(np.float32) / r
    # PwT[w, wp] = 1/r if w // r == wp      (W, Wp)
    pw_t = (np.arange(W)[:, None] // r == np.arange(Wp)[None, :]).astype(np.float32) / r
    # Block-diagonal height pooling acting on (c, h) rows:  I_C (x) Ph
    phc = np.kron(np.eye(C, dtype=np.float32), ph)                # (C*Hp, C*H)
    return jnp.asarray(pw_t), jnp.asarray(phc)


@partial(jax.jit, static_argnums=(3,))
def single_embedding_pallas(x_nchw, weight, bias, r):
    """x_nchw: (B, C, H, W), weight: (E, C), bias: (E,). Returns (B, E, H//r, W//r)."""
    B, C, H, W = x_nchw.shape
    E = weight.shape[0]
    assert H % r == 0 and W % r == 0, "AvgPool window must divide H and W"
    Hp, Wp = H // r, W // r

    pw_t, phc = _pool_constants(C, H, W, r)

    # 1x1 conv acting on (c, hp) rows: kron(weight, I_Hp) -> (E*Hp, C*Hp). Tiny.
    wk = jnp.kron(weight.astype(jnp.float32), jnp.eye(Hp, dtype=jnp.float32))
    # Bias per output row (e, hp); pooling rows sum to 1 so adding it after
    # the pool is exact.
    bias_k = jnp.repeat(bias.astype(jnp.float32), Hp).reshape(E * Hp, 1)

    # Free view of contiguous NCHW — no transposes, no extra XLA copy kernels.
    x2 = x_nchw.reshape(B, C * H, W)

    out = pl.pallas_call(
        _embed_kernel,
        out_shape=jax.ShapeDtypeStruct((B, E * Hp, Wp), jnp.float32),
        grid_spec=pltpu.PrefetchScalarGridSpec(
            num_scalar_prefetch=0,
            grid=(B,),
            in_specs=[
                pl.BlockSpec((1, C * H, W), lambda b: (b, 0, 0)),
                pl.BlockSpec((W, Wp), lambda b: (0, 0)),
                pl.BlockSpec((C * Hp, C * H), lambda b: (0, 0)),
                pl.BlockSpec((E * Hp, C * Hp), lambda b: (0, 0)),
                pl.BlockSpec((E * Hp, 1), lambda b: (0, 0)),
            ],
            out_specs=pl.BlockSpec((1, E * Hp, Wp), lambda b: (b, 0, 0)),
        ),
        compiler_params=pltpu.CompilerParams(
            dimension_semantics=("parallel",)),  # megacore on v7x; harmless elsewhere
    )(x2, pw_t, phc, wk, bias_k)

    # Free view back to NCHW: (B, E*Hp, Wp) -> (B, E, Hp, Wp).
    return out.reshape(B, E, Hp, Wp)


def single_embedding_ref(x_nchw, weight, bias, r):
    """Pure-JAX reference matching PyTorch semantics (1x1 Conv2d -> AvgPool2d)."""
    y = jnp.einsum('bchw,ec->behw', x_nchw, weight) + bias[None, :, None, None]
    B, E, H, W = y.shape
    return y.reshape(B, E, H // r, r, W // r, r).mean(axis=(3, 5))


if __name__ == "__main__":
    # Module hyperparameters (small, consistent with the forward):
    #   img_size = 32 -> R = 256 // 32 = 8, r = 256 // (16 * 8) = 2  (AvgPool 2x2)
    B, in_ch, img_size, embed_dim = 2, 4, 32, 32
    R = 256 // img_size
    r = 256 // (16 * R)

    key = jax.random.PRNGKey(0)
    kx, kw, kb = jax.random.split(key, 3)

    x = jax.random.normal(kx, (B, in_ch, img_size, img_size), dtype=jnp.float32)
    # Deterministic conv parameter init (Conv2d(in_ch, embed_dim, kernel 1x1)):
    bound = 1.0 / np.sqrt(in_ch)
    weight = jax.random.uniform(kw, (embed_dim, in_ch), jnp.float32, -bound, bound)
    bias = jax.random.uniform(kb, (embed_dim,), jnp.float32, -bound, bound)

    out = single_embedding_pallas(x, weight, bias, r)
    out = jax.block_until_ready(out)

    ref = single_embedding_ref(x, weight, bias, r)
    assert out.shape == (B, embed_dim, img_size // r, img_size // r), out.shape
    np.testing.assert_allclose(np.asarray(out), np.asarray(ref), rtol=5e-5, atol=1e-5)

    print("KERNEL_OK")
</pallas_src>

<mosaic_0001>
module attributes {stable_mosaic.version = 11 : i64} {
  func.func @_embed_kernel(%arg0: i32, %arg1: memref<1x128x32xf32, #tpu.memory_space<vmem>>, %arg2: memref<32x16xf32, #tpu.memory_space<vmem>>, %arg3: memref<64x128xf32, #tpu.memory_space<vmem>>, %arg4: memref<512x64xf32, #tpu.memory_space<vmem>>, %arg5: memref<512x1xf32, #tpu.memory_space<vmem>>, %arg6: memref<1x512x16xf32, #tpu.memory_space<vmem>>) attributes {dimension_semantics = [#tpu.dimension_semantics<parallel>], iteration_bounds = array<i64: 2>, scalar_prefetch = 0 : i64, scratch_operands = 0 : i64, tpu.core_type = #tpu.core_type<tc>, window_params = [{transform_indices = @transform_0, window_bounds = array<i64: 1, 128, 32>}, {pipeline_mode = #tpu.pipeline_mode<synchronous>, transform_indices = @transform_1, window_bounds = array<i64: 32, 16>}, {pipeline_mode = #tpu.pipeline_mode<synchronous>, transform_indices = @transform_2, window_bounds = array<i64: 64, 128>}, {pipeline_mode = #tpu.pipeline_mode<synchronous>, transform_indices = @transform_3, window_bounds = array<i64: 512, 64>}, {pipeline_mode = #tpu.pipeline_mode<synchronous>, transform_indices = @transform_4, window_bounds = array<i64: 512, 1>}, {transform_indices = @transform_5, window_bounds = array<i64: 1, 512, 16>}]} {
    %c0 = arith.constant 0 : index
    %c0_0 = arith.constant 0 : index
    %c0_1 = arith.constant 0 : index
    %0 = vector.load %arg1[%c0, %c0_0, %c0_1] : memref<1x128x32xf32, #tpu.memory_space<vmem>>, vector<1x128x32xf32>
    %1 = vector.shape_cast %0 : vector<1x128x32xf32> to vector<128x32xf32>
    %c0_2 = arith.constant 0 : index
    %c0_3 = arith.constant 0 : index
    %2 = vector.load %arg2[%c0_2, %c0_3] : memref<32x16xf32, #tpu.memory_space<vmem>>, vector<32x16xf32>
    %cst = arith.constant dense<0.000000e+00> : vector<128x16xf32>
    %3 = tpu.matmul %1, %2, %cst {dimension_numbers = #tpu.dot_dimension_numbers<[1], [0], [0], [1], [0, 0, 1, 1], [], []>} : vector<128x32xf32>, vector<32x16xf32>, vector<128x16xf32> -> vector<128x16xf32>
    %c0_4 = arith.constant 0 : index
    %c0_5 = arith.constant 0 : index
    %4 = vector.load %arg3[%c0_4, %c0_5] : memref<64x128xf32, #tpu.memory_space<vmem>>, vector<64x128xf32>
    %cst_6 = arith.constant dense<0.000000e+00> : vector<64x16xf32>
    %5 = tpu.matmul %4, %3, %cst_6 {dimension_numbers = #tpu.dot_dimension_numbers<[1], [0], [0], [1], [0, 0, 1, 1], [], []>} : vector<64x128xf32>, vector<128x16xf32>, vector<64x16xf32> -> vector<64x16xf32>
    %c0_7 = arith.constant 0 : index
    %c0_8 = arith.constant 0 : index
    %6 = vector.load %arg4[%c0_7, %c0_8] : memref<512x64xf32, #tpu.memory_space<vmem>>, vector<512x64xf32>
    %cst_9 = arith.constant dense<0.000000e+00> : vector<512x16xf32>
    %7 = tpu.matmul %6, %5, %cst_9 {dimension_numbers = #tpu.dot_dimension_numbers<[1], [0], [0], [1], [0, 0, 1, 1], [], []>} : vector<512x64xf32>, vector<64x16xf32>, vector<512x16xf32> -> vector<512x16xf32>
    %c0_10 = arith.constant 0 : index
    %c0_11 = arith.constant 0 : index
    %8 = vector.load %arg5[%c0_10, %c0_11] : memref<512x1xf32, #tpu.memory_space<vmem>>, vector<512x1xf32>
    %9 = vector.broadcast %8 : vector<512x1xf32> to vector<512x16xf32>
    %10 = arith.addf %7, %9 : vector<512x16xf32>
    %c0_12 = arith.constant 0 : index
    %c0_13 = arith.constant 0 : index
    %c0_14 = arith.constant 0 : index
    %11 = vector.load %arg6[%c0_12, %c0_13, %c0_14] : memref<1x512x16xf32, #tpu.memory_space<vmem>>, vector<1x512x16xf32>
    %12 = vector.shape_cast %11 : vector<1x512x16xf32> to vector<512x16xf32>
    %13 = vector.shape_cast %10 : vector<512x16xf32> to vector<1x512x16xf32>
    tpu.vector_store %arg6[%c0_12, %c0_13, %c0_14], %13 {strides = array<i32>} : memref<1x512x16xf32, #tpu.memory_space<vmem>>, vector<1x512x16xf32>,
    return
  }
  func.func @transform_0(%arg0: i32) -> (i32, i32, i32) {
    %c0_i32 = arith.constant 0 : i32
    %c0_i32_0 = arith.constant 0 : i32
    %c0_i32_1 = arith.constant 0 : i32
    return %arg0, %c0_i32, %c0_i32_0 : i32, i32, i32
  }
  func.func @transform_1(%arg0: i32) -> (i32, i32) {
    %c0_i32 = arith.constant 0 : i32
    %c0_i32_0 = arith.constant 0 : i32
    %c0_i32_1 = arith.constant 0 : i32
    return %c0_i32, %c0_i32_0 : i32, i32
  }
  func.func @transform_2(%arg0: i32) -> (i32, i32) {
    %c0_i32 = arith.constant 0 : i32
    %c0_i32_0 = arith.constant 0 : i32
    %c0_i32_1 = arith.constant 0 : i32
    return %c0_i32, %c0_i32_0 : i32, i32
  }
  func.func @transform_3(%arg0: i32) -> (i32, i32) {
    %c0_i32 = arith.constant 0 : i32
    %c0_i32_0 = arith.constant 0 : i32
    %c0_i32_1 = arith.constant 0 : i32
    return %c0_i32, %c0_i32_0 : i32, i32
  }
  func.func @transform_4(%arg0: i32) -> (i32, i32) {
    %c0_i32 = arith.constant 0 : i32
    %c0_i32_0 = arith.constant 0 : i32
    %c0_i32_1 = arith.constant 0 : i32
    return %c0_i32, %c0_i32_0 : i32, i32
  }
  func.func @transform_5(%arg0: i32) -> (i32, i32, i32) {
    %c0_i32 = arith.constant 0 : i32
    %c0_i32_0 = arith.constant 0 : i32
    %c0_i32_1 = arith.constant 0 : i32
    return %arg0, %c0_i32, %c0_i32_0 : i32, i32, i32
  }
}

</mosaic_0001>

<bundles_post_ra>
// kernel: single_embedding_pallas.1
= control target key start
LH: loop header
LB: loop body
LE: loop exit
PB: predicated region body
PF: predicated region fallthrough
CT: control target
= control target key end

     0   :  { %s2209_s18 = smov 0   ;;  %s3013_s0 = inlined_call_operand.vmem [shape: f32[2,128,32], index: 0, kind: input, shape index: {}]   ;;  %s3014_s1 = inlined_call_operand.vmem [shape: f32[32,16], index: 1, kind: input, shape index: {}]   ;;  %s3015_s2 = inlined_call_operand.vmem [shape: f32[64,128], index: 2, kind: input, shape index: {}]   ;;  %s3016_s3 = inlined_call_operand.vmem [shape: f32[512,64], index: 3, kind: input, shape index: {}]   ;;  %s3017_s4 = inlined_call_operand.vmem [shape: f32[512,1], index: 4, kind: input, shape index: {}]   ;;  %s3018_s5 = inlined_call_operand.vmem [shape: f32[2,512,16], index: 5, kind: output, shape index: {}]  }
   0x1 LB: > { %s1698_s19 = sadd.s32 4294967295, %s2176_s18   ;;  %p1702_p0 = scmp.ge.s32.totalorder %s2176_s18, 1  ;;  %s2176_s18 = sphi %s2209_s18, %s15_s18  }
   0x2   : > { %p187_p1 = scmp.lt.s32.totalorder %s2176_s18, 3 }
   0x4   : > { %p188_p2 = pnand %p1702_p0, %p187_p1 }
   0x5   : > { %v241_v0 = vld [vmem:[%s3014_s1] sm:$0xff] (!%p188_p2)  ;;  %v242_v1 = vld [vmem:[%s3014_s1 + $0x8] sm:$0xff] (!%p188_p2)  ;;  %v243_v2 = vld [vmem:[%s3014_s1 + $0x10] sm:$0xff] (!%p188_p2)  ;;  %p215_p3 = scmp.lt.s32.totalorder (!%p188_p2), %s1698_s19, 1  ;;  %vm245_vm0 = vcmask (!%p188_p2), 261120   ;;  %v2178_v25 = vmov (!%p188_p2), 0  }
   0x6   : > { %191 = sbr.rel (%p188_p2) target bundleno = 776 (0x308), region = 40  ;;  %v2095_v3 = vpack.c.bf16 (!%p188_p2), %v242_v1, %v241_v0  ;;  %v244_v4 = vld [vmem:[%s3014_s1 + $0x18] sm:$0xff] (!%p188_p2)  ;;  %v439_v22 = vld [vmem:[%s3015_s2] sm:$0xff] (!%p188_p2)  ;;  %v618_v23 = vld [vmem:[%s3017_s4 + $0x10] sm:$0xff] (!%p188_p2)  ;;  %2169 = vset.pattern.permute.xlu1 (!%p188_p2), %v2178_v25  ;;  %2168 = vset.pattern.permute.xlu0 (!%p188_p2), %v2178_v25  ;;  %vm1000_vm1 = vcmask (!%p188_p2), 523264   ;;  %vm1578_vm2 = vcmask (!%p188_p2), 130048  }
   0x7   : > { %v2099_v5 = vpack.c.bf16 (!%p188_p2), %v244_v4, %v243_v2  ;;  %1971 = vmatprep.mubr.f32.mxu1 (!%p188_p2), %v439_v22  ;;  %v616_v24 = vld [vmem:[%s3017_s4] sm:$0xff] (!%p188_p2)  ;;  %692 = vperm.xlu1 (!%p188_p2), %2169, %v618_v23   ;;  %v619_v26 = vld [vmem:[%s3017_s4 + $0x18] sm:$0xff] (!%p188_p2)  ;;  %v617_v27 = vld [vmem:[%s3017_s4 + $0x8] sm:$0xff] (!%p188_p2) }
   0x8   : > { %2096 = vmatprep.subr.bf16.mxu0 (!%p188_p2), %v2095_v3  ;;  %682 = vperm.xlu0 (!%p188_p2), %2168, %v616_v24   ;;  %v621_v28 = vld [vmem:[%s3017_s4 + $0x28] sm:$0xff] (!%p188_p2)  ;;  %v620_v29 = vld [vmem:[%s3017_s4 + $0x20] sm:$0xff] (!%p188_p2)  ;;  %v623_v30 = vld [vmem:[%s3017_s4 + $0x38] sm:$0xff] (!%p188_p2) }
   0x9   : > { %2098 = vmatpush3.bf16.msra.mxu0 (!%p188_p2), %v2095_v3  ;;  %v622_v31 = vld [vmem:[%s3017_s4 + $0x30] sm:$0xff] (!%p188_p2)  ;;  %v625_v32 = vld [vmem:[%s3017_s4 + $0x48] sm:$0xff] (!%p188_p2)  ;;  %v624_v33 = vld [vmem:[%s3017_s4 + $0x40] sm:$0xff] (!%p188_p2) }
   0xa   : > { %2100 = vmatprep.subr.bf16.mxu0 (!%p188_p2), %v2099_v5  ;;  %v627_v34 = vld [vmem:[%s3017_s4 + $0x58] sm:$0xff] (!%p188_p2)  ;;  %v626_v35 = vld [vmem:[%s3017_s4 + $0x50] sm:$0xff] (!%p188_p2)  ;;  %v629_v36 = vld [vmem:[%s3017_s4 + $0x68] sm:$0xff] (!%p188_p2) }
   0xb   : > { %697 = vperm.xlu1 (!%p188_p2), %2169, %v619_v26   ;;  %v628_v37 = vld [vmem:[%s3017_s4 + $0x60] sm:$0xff] (!%p188_p2)  ;;  %v631_v38 = vld [vmem:[%s3017_s4 + $0x78] sm:$0xff] (!%p188_p2)  ;;  %v630_v39 = vld [vmem:[%s3017_s4 + $0x70] sm:$0xff] (!%p188_p2) }
   0xc   : > { %687 = vperm.xlu0 (!%p188_p2), %2168, %v617_v27   ;;  %v633_v40 = vld [vmem:[%s3017_s4 + $0x88] sm:$0xff] (!%p188_p2)  ;;  %v632_v41 = vld [vmem:[%s3017_s4 + $0x80] sm:$0xff] (!%p188_p2)  ;;  %v635_v42 = vld [vmem:[%s3017_s4 + $0x98] sm:$0xff] (!%p188_p2) }
   0xd   : > { %s3020_s19 = smov (!%p215_p3, %s1698_s19), 1  ;;  %2102 = vmatpush3.bf16.msra.mxu0 %v2099_v5  ;;  %v634_v43 = vld [vmem:[%s3017_s4 + $0x90] sm:$0xff]  ;;  %v637_v44 = vld [vmem:[%s3017_s4 + $0xa8] sm:$0xff]  ;;  %v636_v45 = vld [vmem:[%s3017_s4 + $0xa0] sm:$0xff] }
   0xe   : > { %s1789_s28 = sshll.u32 %s3020_s19, 7  ;;  %v639_v46 = vld [vmem:[%s3017_s4 + $0xb8] sm:$0xff]  ;;  %v638_v47 = vld [vmem:[%s3017_s4 + $0xb0] sm:$0xff]  ;;  %v641_v48 = vld [vmem:[%s3017_s4 + $0xc8] sm:$0xff] }
   0xf   : > { %s2235_s6 = scalar_lea.vmem %s3013_s0, %s1789_s28  ;;  %707 = vperm.xlu1 %2169, %v621_v28   ;;  %v640_v49 = vld [vmem:[%s3017_s4 + $0xc0] sm:$0xff]  ;;  %v643_v50 = vld [vmem:[%s3017_s4 + $0xd8] sm:$0xff]  ;;  %v642_v51 = vld [vmem:[%s3017_s4 + $0xd0] sm:$0xff]  ;;  %s1790_s28 = sshll.u32 %s3020_s19, 9 }
  0x10   : > { %v225_v6 = vld [vmem:[%s2235_s6] sm:$0xff]  ;;  %v226_v7 = vld [vmem:[%s2235_s6 + $0x8] sm:$0xff]  ;;  %v227_v8 = vld [vmem:[%s2235_s6 + $0x10] sm:$0xff]  ;;  %702 = vperm.xlu0 %2168, %v620_v29  }
  0x11   : > { %1915 = vmatprep.mubr.msk.f32.mxu0 %vm245_vm0, %v225_v6  ;;  %v228_v9 = vld [vmem:[%s2235_s6 + $0x18] sm:$0xff]  ;;  %v229_v10 = vld [vmem:[%s2235_s6 + $0x20] sm:$0xff]  ;;  %v230_v11 = vld [vmem:[%s2235_s6 + $0x28] sm:$0xff] }
  0x12   : > { %1916 = vmatmul.mubr.msk.f32.vlgmr.msra.gmra.mrb[0].mxu0 %vm245_vm0, %v226_v7  ;;  %v231_v12 = vld [vmem:[%s2235_s6 + $0x30] sm:$0xff]  ;;  %v232_v13 = vld [vmem:[%s2235_s6 + $0x38] sm:$0xff]  ;;  %v233_v14 = vld [vmem:[%s2235_s6 + $0x40] sm:$0xff] }
  0x13   : > { %1918 = vmatprep.mubr.msk.f32.mxu0 %vm245_vm0, %v227_v8  ;;  %v234_v15 = vld [vmem:[%s2235_s6 + $0x48] sm:$0xff]  ;;  %v235_v16 = vld [vmem:[%s2235_s6 + $0x50] sm:$0xff]  ;;  %v236_v17 = vld [vmem:[%s2235_s6 + $0x58] sm:$0xff]  ;;  %717 = vperm.xlu1 %2169, %v623_v30  }
  0x14   : > { %v237_v18 = vld [vmem:[%s2235_s6 + $0x60] sm:$0xff]  ;;  %v238_v19 = vld [vmem:[%s2235_s6 + $0x68] sm:$0xff]  ;;  %v239_v20 = vld [vmem:[%s2235_s6 + $0x70] sm:$0xff]  ;;  %712 = vperm.xlu0 %2168, %v622_v31  }
  0x15   : > { %v240_v21 = vld [vmem:[%s2235_s6 + $0x78] sm:$0xff]  ;;  %v645_v52 = vld [vmem:[%s3017_s4 + $0xe8] sm:$0xff]  ;;  %v644_v53 = vld [vmem:[%s3017_s4 + $0xe0] sm:$0xff]  ;;  %s2825_s6 = scalar_lea.vmem %s3018_s5, %s1790_s28 }
  0x16   : > { %1919 = vmatmul.mubr.msk.f32.gmra.mrb[2].mxu0 %vm245_vm0, %v228_v9  ;;  %v647_v54 = vld [vmem:[%s3017_s4 + $0xf8] sm:$0xff]  ;;  %v646_v55 = vld [vmem:[%s3017_s4 + $0xf0] sm:$0xff]  ;;  %v649_v23 = vld [vmem:[%s3017_s4 + $0x108] sm:$0xff] }
  0x17   : > { %1921 = vmatprep.mubr.msk.f32.mxu0 %vm245_vm0, %v229_v10  ;;  %727 = vperm.xlu1 %2169, %v625_v32   ;;  %v446_v22 = vld [vmem:[%s3015_s2 + $0x38] sm:$0xff]  ;;  %v648_v24 = vld [vmem:[%s3017_s4 + $0x100] sm:$0xff]  ;;  %v650_v26 = vld [vmem:[%s3017_s4 + $0x110] sm:$0xff] }
  0x18   : > { %722 = vperm.xlu0 %2168, %v624_v33   ;;  %v651_v25 = vld [vmem:[%s3017_s4 + $0x118] sm:$0xff]  ;;  %v653_v27 = vld [vmem:[%s3017_s4 + $0x128] sm:$0xff]  ;;  %v652_v28 = vld [vmem:[%s3017_s4 + $0x120] sm:$0xff] }
  0x19   : > { %v655_v29 = vld [vmem:[%s3017_s4 + $0x138] sm:$0xff]  ;;  %v654_v30 = vld [vmem:[%s3017_s4 + $0x130] sm:$0xff]  ;;  %v657_v31 = vld [vmem:[%s3017_s4 + $0x148] sm:$0xff] }
  0x1a   : > { %1922 = vmatmul.mubr.msk.f32.gmra.mrb[4].mxu0 %vm245_vm0, %v230_v11  ;;  %v656_v32 = vld [vmem:[%s3017_s4 + $0x140] sm:$0xff]  ;;  %v659_v33 = vld [vmem:[%s3017_s4 + $0x158] sm:$0xff] }
  0x1b   : > { %1924 = vmatprep.mubr.msk.f32.mxu0 %vm245_vm0, %v231_v12  ;;  %737 = vperm.xlu1 %2169, %v627_v34   ;;  %v658_v34 = vld [vmem:[%s3017_s4 + $0x150] sm:$0xff] }
  0x1c   : > { %732 = vperm.xlu0 %2168, %v626_v35   ;;  %v661_v35 = vld [vmem:[%s3017_s4 + $0x168] sm:$0xff] }
  0x1e   : > { %1925 = vmatmul.mubr.msk.f32.gmra.mrb[6].mxu0 %vm245_vm0, %v232_v13 }
  0x1f   : > { %1927 = vmatprep.mubr.msk.f32.mxu0 %vm245_vm0, %v233_v14  ;;  %747 = vperm.xlu1 %2169, %v629_v36   ;;  %v660_v36 = vld [vmem:[%s3017_s4 + $0x160] sm:$0xff] }
  0x20   : > { %742 = vperm.xlu0 %2168, %v628_v37   ;;  %v663_v37 = vld [vmem:[%s3017_s4 + $0x178] sm:$0xff] }
  0x22   : > { %1928 = vmatmul.mubr.msk.f32.gmra.mrb[8].mxu0 %vm245_vm0, %v234_v15 }
  0x23   : > { %1930 = vmatprep.mubr.msk.f32.mxu0 %vm245_vm0, %v235_v16  ;;  %757 = vperm.xlu1 %2169, %v631_v38   ;;  %v440_v16 = vld [vmem:[%s3015_s2 + $0x8] sm:$0xff]  ;;  %v662_v38 = vld [vmem:[%s3017_s4 + $0x170] sm:$0xff] }
  0x24   : > { %752 = vperm.xlu0 %2168, %v630_v39   ;;  %v665_v39 = vld [vmem:[%s3017_s4 + $0x188] sm:$0xff] }
  0x26   : > { %1931 = vmatmul.mubr.msk.f32.gmra.mrb[10].mxu0 %vm245_vm0, %v236_v17  ;;  %v441_v17 = vld [vmem:[%s3015_s2 + $0x10] sm:$0xff] }
  0x27   : > { %1933 = vmatprep.mubr.msk.f32.mxu0 %vm245_vm0, %v237_v18  ;;  %767 = vperm.xlu1 %2169, %v633_v40   ;;  %v442_v18 = vld [vmem:[%s3015_s2 + $0x18] sm:$0xff]  ;;  %v664_v40 = vld [vmem:[%s3017_s4 + $0x180] sm:$0xff] }
  0x28   : > { %762 = vperm.xlu0 %2168, %v632_v41   ;;  %v552_v41 = vld [vmem:[%s3016_s3] sm:$0xff] }
  0x2a   : > { %1934 = vmatmul.mubr.msk.f32.gmra.mrb[12].mxu0 %vm245_vm0, %v238_v19  ;;  %v443_v19 = vld [vmem:[%s3015_s2 + $0x20] sm:$0xff] }
  0x2b   : > { %1936 = vmatprep.mubr.msk.f32.mxu0 %vm245_vm0, %v239_v20  ;;  %777 = vperm.xlu1 %2169, %v635_v42   ;;  %v444_v20 = vld [vmem:[%s3015_s2 + $0x28] sm:$0xff]  ;;  %v586_v42 = vld [vmem:[%s3016_s3 + $0x110] sm:$0xff] }
  0x2c   : > { %772 = vperm.xlu0 %2168, %v634_v43   ;;  %v667_v43 = vld [vmem:[%s3017_s4 + $0x198] sm:$0xff] }
  0x2e   : > { %1937 = vmatmul.mubr.msk.f32.gmra.mrb[14].mxu0 %vm245_vm0, %v240_v21  ;;  %v445_v21 = vld [vmem:[%s3015_s2 + $0x30] sm:$0xff] }
  0x2f   : > { %787 = vperm.xlu1 %2169, %v637_v44   ;;  %1999 = vmatprep.mubr.msk.f32.mxu0 %vm1000_vm1, %v552_v41  ;;  %v666_v44 = vld [vmem:[%s3017_s4 + $0x190] sm:$0xff]  ;;  %v571_v41 = vld [vmem:[%s3016_s3 + $0x98] sm:$0xff] }
  0x30   : > { %782 = vperm.xlu0 %2168, %v636_v45   ;;  %v669_v45 = vld [vmem:[%s3017_s4 + $0x1a8] sm:$0xff] }
  0x33   : > { %797 = vperm.xlu1 %2169, %v639_v46   ;;  %v668_v46 = vld [vmem:[%s3017_s4 + $0x1a0] sm:$0xff] }
  0x34   : > { %792 = vperm.xlu0 %2168, %v638_v47   ;;  %v671_v47 = vld [vmem:[%s3017_s4 + $0x1b8] sm:$0xff] }
  0x37   : > { %807 = vperm.xlu1 %2169, %v641_v48   ;;  %v670_v48 = vld [vmem:[%s3017_s4 + $0x1b0] sm:$0xff] }
  0x38   : > { %802 = vperm.xlu0 %2168, %v640_v49   ;;  %v673_v49 = vld [vmem:[%s3017_s4 + $0x1c8] sm:$0xff] }
  0x3b   : > { %817 = vperm.xlu1 %2169, %v643_v50   ;;  %v672_v50 = vld [vmem:[%s3017_s4 + $0x1c0] sm:$0xff] }
  0x3c   : > { %812 = vperm.xlu0 %2168, %v642_v51   ;;  %v675_v51 = vld [vmem:[%s3017_s4 + $0x1d8] sm:$0xff] }
  0x3f   : > { %827 = vperm.xlu1 %2169, %v645_v52   ;;  %v674_v52 = vld [vmem:[%s3017_s4 + $0x1d0] sm:$0xff] }
  0x40   : > { %822 = vperm.xlu0 %2168, %v644_v53   ;;  %v677_v53 = vld [vmem:[%s3017_s4 + $0x1e8] sm:$0xff] }
  0x43   : > { %837 = vperm.xlu1 %2169, %v647_v54   ;;  %v676_v54 = vld [vmem:[%s3017_s4 + $0x1e0] sm:$0xff] }
  0x44   : > { %832 = vperm.xlu0 %2168, %v646_v55   ;;  %v679_v55 = vld [vmem:[%s3017_s4 + $0x1f8] sm:$0xff] }
  0x47   : > { %847 = vperm.xlu1 %2169, %v649_v23   ;;  %v562_v23 = vld [vmem:[%s3016_s3 + $0x50] sm:$0xff] }
  0x48   : > { %842 = vperm.xlu0 %2168, %v648_v24   ;;  %v596_v24 = vld [vmem:[%s3016_s3 + $0x160] sm:$0xff] }
  0x4b   : > { %857 = vperm.xlu1 %2169, %v651_v25   ;;  %v563_v25 = vld [vmem:[%s3016_s3 + $0x58] sm:$0xff] }
  0x4c   : > { %852 = vperm.xlu0 %2168, %v650_v26   ;;  %v597_v26 = vld [vmem:[%s3016_s3 + $0x168] sm:$0xff] }
  0x4f   : > { %867 = vperm.xlu1 %2169, %v653_v27   ;;  %v564_v27 = vld [vmem:[%s3016_s3 + $0x60] sm:$0xff] }
  0x50   : > { %862 = vperm.xlu0 %2168, %v652_v28   ;;  %v598_v28 = vld [vmem:[%s3016_s3 + $0x170] sm:$0xff] }
  0x53   : > { %877 = vperm.xlu1 %2169, %v655_v29   ;;  %v565_v29 = vld [vmem:[%s3016_s3 + $0x68] sm:$0xff] }
  0x54   : > { %872 = vperm.xlu0 %2168, %v654_v30   ;;  %v599_v30 = vld [vmem:[%s3016_s3 + $0x178] sm:$0xff] }
  0x57   : > { %887 = vperm.xlu1 %2169, %v657_v31   ;;  %v566_v31 = vld [vmem:[%s3016_s3 + $0x70] sm:$0xff] }
  0x58   : > { %882 = vperm.xlu0 %2168, %v656_v32   ;;  %v600_v32 = vld [vmem:[%s3016_s3 + $0x180] sm:$0xff] }
  0x5b   : > { %897 = vperm.xlu1 %2169, %v659_v33   ;;  %v567_v33 = vld [vmem:[%s3016_s3 + $0x78] sm:$0xff] }
  0x5c   : > { %892 = vperm.xlu0 %2168, %v658_v34   ;;  %v601_v34 = vld [vmem:[%s3016_s3 + $0x188] sm:$0xff] }
  0x5f   : > { %907 = vperm.xlu1 %2169, %v661_v35   ;;  %v568_v35 = vld [vmem:[%s3016_s3 + $0x80] sm:$0xff] }
  0x60   : > { %902 = vperm.xlu0 %2168, %v660_v36   ;;  %v602_v36 = vld [vmem:[%s3016_s3 + $0x190] sm:$0xff] }
  0x63   : > { %917 = vperm.xlu1 %2169, %v663_v37   ;;  %v569_v37 = vld [vmem:[%s3016_s3 + $0x88] sm:$0xff] }
  0x64   : > { %912 = vperm.xlu0 %2168, %v662_v38   ;;  %v603_v38 = vld [vmem:[%s3016_s3 + $0x198] sm:$0xff] }
  0x67   : > { %927 = vperm.xlu1 %2169, %v665_v39   ;;  %v570_v39 = vld [vmem:[%s3016_s3 + $0x90] sm:$0xff] }
  0x68   : > { %922 = vperm.xlu0 %2168, %v664_v40   ;;  %v604_v40 = vld [vmem:[%s3016_s3 + $0x1a0] sm:$0xff] }
  0x6b   : > { %937 = vperm.xlu1 %2169, %v667_v43   ;;  %v572_v43 = vld [vmem:[%s3016_s3 + $0xa0] sm:$0xff] }
  0x6c   : > { %932 = vperm.xlu0 %2168, %v666_v44   ;;  %v606_v44 = vld [vmem:[%s3016_s3 + $0x1b0] sm:$0xff] }
  0x6f   : > { %947 = vperm.xlu1 %2169, %v669_v45   ;;  %v573_v45 = vld [vmem:[%s3016_s3 + $0xa8] sm:$0xff] }
  0x70   : > { %942 = vperm.xlu0 %2168, %v668_v46   ;;  %v607_v46 = vld [vmem:[%s3016_s3 + $0x1b8] sm:$0xff] }
  0x73   : > { %957 = vperm.xlu1 %2169, %v671_v47   ;;  %v574_v47 = vld [vmem:[%s3016_s3 + $0xb0] sm:$0xff] }
  0x74   : > { %952 = vperm.xlu0 %2168, %v670_v48   ;;  %v608_v48 = vld [vmem:[%s3016_s3 + $0x1c0] sm:$0xff] }
  0x77   : > { %967 = vperm.xlu1 %2169, %v673_v49   ;;  %v575_v49 = vld [vmem:[%s3016_s3 + $0xb8] sm:$0xff] }
  0x78   : > { %962 = vperm.xlu0 %2168, %v672_v50   ;;  %v609_v50 = vld [vmem:[%s3016_s3 + $0x1c8] sm:$0xff] }
  0x7b   : > { %977 = vperm.xlu1 %2169, %v675_v51   ;;  %v576_v51 = vld [vmem:[%s3016_s3 + $0xc0] sm:$0xff] }
  0x7c   : > { %972 = vperm.xlu0 %2168, %v674_v52   ;;  %v610_v52 = vld [vmem:[%s3016_s3 + $0x1d0] sm:$0xff] }
  0x7f   : > { %987 = vperm.xlu1 %2169, %v677_v53   ;;  %v577_v53 = vld [vmem:[%s3016_s3 + $0xc8] sm:$0xff] }
  0x80   : > { %982 = vperm.xlu0 %2168, %v676_v54   ;;  %v611_v54 = vld [vmem:[%s3016_s3 + $0x1d8] sm:$0xff] }
  0x83   : > { %997 = vperm.xlu1 %2169, %v679_v55   ;;  %v578_v55 = vld [vmem:[%s3016_s3 + $0xd0] sm:$0xff] }
  0xe5   : > { %v1917_v56 = vpop.f32.mrb[0].mxu0 }
  0xe6   : > { %v360_v57 = vpop.f32.mrb[1].mxu0 }
  0xe7   : > { %v2103_v58 = vpack.c.bf16 %v1917_v56, %v360_v57  ;;  %v678_v56 = vld [vmem:[%s3017_s4 + $0x1f0] sm:$0xff] }
  0xe8   : > { %992 = vperm.xlu0 %2168, %v678_v56   ;;  %v612_v56 = vld [vmem:[%s3016_s3 + $0x1e0] sm:$0xff] }
  0xe9   : > { %v1920_v59 = vpop.f32.mrb[2].mxu0  ;;  %2104 = vmatprep.subr.bf16.mxu1 %v2103_v58 }
  0xea   : > { %v370_v60 = vpop.f32.mrb[3].mxu0  ;;  %2106 = vmatpush3.bf16.msra.mxu1 %v2103_v58 }
  0xeb   : > { %v2107_v61 = vpack.c.bf16 %v1920_v59, %v370_v60 }
  0xed   : > { %v1923_v62 = vpop.f32.mrb[4].mxu0  ;;  %2108 = vmatprep.subr.bf16.mxu1 %v2107_v61 }
  0xee   : > { %v380_v63 = vpop.f32.mrb[5].mxu0  ;;  %2110 = vmatpush3.bf16.msra.mxu1 %v2107_v61 }
  0xef   : > { %v2111_v0 = vpack.c.bf16 %v1923_v62, %v380_v63 }
  0xf1   : > { %v1926_v1 = vpop.f32.mrb[6].mxu0  ;;  %2112 = vmatprep.subr.bf16.mxu1 %v2111_v0 }
  0xf2   : > { %v390_v2 = vpop.f32.mrb[7].mxu0  ;;  %2114 = vmatpush3.bf16.msra.mxu1 %v2111_v0 }
  0xf3   : > { %v2115_v3 = vpack.c.bf16 %v1926_v1, %v390_v2 }
  0xf5   : > { %v1929_v4 = vpop.f32.mrb[8].mxu0  ;;  %2116 = vmatprep.subr.bf16.mxu1 %v2115_v3 }
  0xf6   : > { %v400_v5 = vpop.f32.mrb[9].mxu0  ;;  %2118 = vmatpush3.bf16.msra.mxu1 %v2115_v3 }
  0xf7   : > { %v2119_v6 = vpack.c.bf16 %v1929_v4, %v400_v5  ;;  %v553_v5 = vld [vmem:[%s3016_s3 + $0x8] sm:$0xff] }
  0xf9   : > { %v1932_v7 = vpop.f32.mrb[10].mxu0  ;;  %2120 = vmatprep.subr.bf16.mxu1 %v2119_v6 }
  0xfa   : > { %v410_v8 = vpop.f32.mrb[11].mxu0  ;;  %2122 = vmatpush3.bf16.msra.mxu1 %v2119_v6  ;;  %v587_v6 = vld [vmem:[%s3016_s3 + $0x118] sm:$0xff] }
  0xfb   : > { %v2123_v9 = vpack.c.bf16 %v1932_v7, %v410_v8  ;;  %v554_v7 = vld [vmem:[%s3016_s3 + $0x10] sm:$0xff]  ;;  %v588_v8 = vld [vmem:[%s3016_s3 + $0x120] sm:$0xff] }
  0xfd   : > { %v1935_v10 = vpop.f32.mrb[12].mxu0  ;;  %2124 = vmatprep.subr.bf16.mxu1 %v2123_v9 }
  0xfe   : > { %v420_v11 = vpop.f32.mrb[13].mxu0  ;;  %2126 = vmatpush3.bf16.msra.mxu1 %v2123_v9  ;;  %v555_v9 = vld [vmem:[%s3016_s3 + $0x18] sm:$0xff] }
  0xff   : > { %v2127_v12 = vpack.c.bf16 %v1935_v10, %v420_v11  ;;  %v589_v10 = vld [vmem:[%s3016_s3 + $0x128] sm:$0xff]  ;;  %v556_v11 = vld [vmem:[%s3016_s3 + $0x20] sm:$0xff] }
 0x101   : > { %v1938_v13 = vpop.f32.mrb[14].mxu0  ;;  %2128 = vmatprep.subr.bf16.mxu1 %v2127_v12 }
 0x102   : > { %v430_v14 = vpop.f32.mrb[15].mxu0  ;;  %2130 = vmatpush3.bf16.msra.mxu1 %v2127_v12  ;;  %v590_v12 = vld [vmem:[%s3016_s3 + $0x130] sm:$0xff] }
 0x103   : > { %v2131_v15 = vpack.c.bf16 %v1938_v13, %v430_v14  ;;  %v557_v13 = vld [vmem:[%s3016_s3 + $0x28] sm:$0xff]  ;;  %v591_v14 = vld [vmem:[%s3016_s3 + $0x138] sm:$0xff] }
 0x105   : > { %2132 = vmatprep.subr.bf16.mxu1 %v2131_v15 }
 0x106   : > { %2134 = vmatpush3.bf16.msra.mxu1 %v2131_v15  ;;  %v558_v15 = vld [vmem:[%s3016_s3 + $0x30] sm:$0xff] }
 0x109   : > { %1972 = vmatmul.mubr.f32.vlgmr.msra.gmra.mrb[0].mxu1 %v440_v16  ;;  %v592_v16 = vld [vmem:[%s3016_s3 + $0x140] sm:$0xff] }
 0x10a   : > { %1974 = vmatprep.mubr.f32.mxu1 %v441_v17  ;;  %v559_v17 = vld [vmem:[%s3016_s3 + $0x38] sm:$0xff] }
 0x10d   : > { %1975 = vmatmul.mubr.f32.gmra.mrb[2].mxu1 %v442_v18  ;;  %v593_v18 = vld [vmem:[%s3016_s3 + $0x148] sm:$0xff] }
 0x10e   : > { %1977 = vmatprep.mubr.f32.mxu1 %v443_v19  ;;  %v560_v19 = vld [vmem:[%s3016_s3 + $0x40] sm:$0xff] }
 0x111   : > { %1978 = vmatmul.mubr.f32.gmra.mrb[4].mxu1 %v444_v20  ;;  %v594_v20 = vld [vmem:[%s3016_s3 + $0x150] sm:$0xff] }
 0x112   : > { %1980 = vmatprep.mubr.f32.mxu1 %v445_v21  ;;  %v561_v21 = vld [vmem:[%s3016_s3 + $0x48] sm:$0xff] }
 0x115   : > { %1981 = vmatmul.mubr.f32.gmra.mrb[6].mxu1 %v446_v22  ;;  %v595_v22 = vld [vmem:[%s3016_s3 + $0x158] sm:$0xff] }
 0x116   : > { %2050 = vmatprep.mubr.msk.f32.mxu1 %vm1000_vm1, %v586_v42  ;;  %v605_v42 = vld [vmem:[%s3016_s3 + $0x1a8] sm:$0xff] }
 0x1dc   : > { %v1973_v57 = vpop.f32.mrb[0].mxu1 }
 0x1dd   : > { %v513_v58 = vpop.f32.mrb[1].mxu1 }
 0x1de   : > { %v2135_v59 = vpack.c.bf16 %v1973_v57, %v513_v58  ;;  %v579_v57 = vld [vmem:[%s3016_s3 + $0xd8] sm:$0xff]  ;;  %v613_v58 = vld [vmem:[%s3016_s3 + $0x1e8] sm:$0xff] }
 0x1e0   : > { %v1976_v60 = vpop.f32.mrb[2].mxu1  ;;  %2136 = vmatprep.subr.bf16.mxu0 %v2135_v59  ;;  %2151 = vmatprep.subr.bf16.mxu1 %v2135_v59 }
 0x1e1   : > { %v523_v61 = vpop.f32.mrb[3].mxu1  ;;  %2138 = vmatpush3.bf16.msra.mxu0 %v2135_v59  ;;  %2155 = vmatpush3.bf16.msra.mxu1 %v2135_v59  ;;  %v580_v59 = vld [vmem:[%s3016_s3 + $0xe0] sm:$0xff] }
 0x1e2   : > { %v2139_v62 = vpack.c.bf16 %v1976_v60, %v523_v61  ;;  %v614_v60 = vld [vmem:[%s3016_s3 + $0x1f0] sm:$0xff]  ;;  %v581_v61 = vld [vmem:[%s3016_s3 + $0xe8] sm:$0xff] }
 0x1e4   : > { %v1979_v63 = vpop.f32.mrb[4].mxu1  ;;  %2140 = vmatprep.subr.bf16.mxu0 %v2139_v62  ;;  %2152 = vmatprep.subr.bf16.mxu1 %v2139_v62 }
 0x1e5   : > { %v533_v0 = vpop.f32.mrb[5].mxu1  ;;  %2142 = vmatpush3.bf16.msra.mxu0 %v2139_v62  ;;  %2156 = vmatpush3.bf16.msra.mxu1 %v2139_v62  ;;  %v615_v62 = vld [vmem:[%s3016_s3 + $0x1f8] sm:$0xff] }
 0x1e6   : > { %v2143_v1 = vpack.c.bf16 %v1979_v63, %v533_v0  ;;  %v582_v63 = vld [vmem:[%s3016_s3 + $0xf0] sm:$0xff]  ;;  %v583_v0 = vld [vmem:[%s3016_s3 + $0xf8] sm:$0xff] }
 0x1e8   : > { %v1982_v2 = vpop.f32.mrb[6].mxu1  ;;  %2144 = vmatprep.subr.bf16.mxu0 %v2143_v1  ;;  %2153 = vmatprep.subr.bf16.mxu1 %v2143_v1 }
 0x1e9   : > { %v543_v3 = vpop.f32.mrb[7].mxu1  ;;  %2146 = vmatpush3.bf16.msra.mxu0 %v2143_v1  ;;  %2157 = vmatpush3.bf16.msra.mxu1 %v2143_v1  ;;  %v584_v1 = vld [vmem:[%s3016_s3 + $0x100] sm:$0xff] }
 0x1ea   : > { %v2147_v4 = vpack.c.bf16 %v1982_v2, %v543_v3  ;;  %v585_v2 = vld [vmem:[%s3016_s3 + $0x108] sm:$0xff]  ;;  %v2741_v3 = vpop.permute.xlu1 %692 }
 0x1ec   : > { %2148 = vmatprep.subr.bf16.mxu0 %v2147_v4  ;;  %2154 = vmatprep.subr.bf16.mxu1 %v2147_v4 }
 0x1ed   : > { %2150 = vmatpush3.bf16.msra.mxu0 %v2147_v4  ;;  %2158 = vmatpush3.bf16.msra.mxu1 %v2147_v4  ;;  %v683_v4 = vpop.permute.xlu0 %682 }
 0x1f0   : > { %2000 = vmatmul.mubr.msk.f32.vlgmr.msra.gmra.mrb[16].mxu0 %vm1000_vm1, %v553_v5  ;;  %2051 = vmatmul.mubr.msk.f32.vlgmr.msra.gmra.mrb[8].mxu1 %vm1000_vm1, %v587_v6  ;;  %v2743_v5 = vpop.permute.xlu1 %697 }
 0x1f1   : > { %2002 = vmatprep.mubr.msk.f32.mxu0 %vm1000_vm1, %v554_v7  ;;  %2053 = vmatprep.mubr.msk.f32.mxu1 %vm1000_vm1, %v588_v8  ;;  %v688_v6 = vpop.permute.xlu0 %687 }
 0x1f4   : > { %2003 = vmatmul.mubr.msk.f32.gmra.mrb[18].mxu0 %vm1000_vm1, %v555_v9  ;;  %2054 = vmatmul.mubr.msk.f32.gmra.mrb[10].mxu1 %vm1000_vm1, %v589_v10  ;;  %v2745_v7 = vpop.permute.xlu1 %707 }
 0x1f5   : > { %2005 = vmatprep.mubr.msk.f32.mxu0 %vm1000_vm1, %v556_v11  ;;  %2056 = vmatprep.mubr.msk.f32.mxu1 %vm1000_vm1, %v590_v12  ;;  %v2747_v8 = vpop.permute.xlu0 %702 }
 0x1f8   : > { %2006 = vmatmul.mubr.msk.f32.gmra.mrb[20].mxu0 %vm1000_vm1, %v557_v13  ;;  %2057 = vmatmul.mubr.msk.f32.gmra.mrb[12].mxu1 %vm1000_vm1, %v591_v14  ;;  %v2749_v9 = vpop.permute.xlu1 %717 }
 0x1f9   : > { %2008 = vmatprep.mubr.msk.f32.mxu0 %vm1000_vm1, %v558_v15  ;;  %2059 = vmatprep.mubr.msk.f32.mxu1 %vm1000_vm1, %v592_v16  ;;  %v2751_v10 = vpop.permute.xlu0 %712 }
 0x1fc   : > { %2009 = vmatmul.mubr.msk.f32.gmra.mrb[22].mxu0 %vm1000_vm1, %v559_v17  ;;  %2060 = vmatmul.mubr.msk.f32.gmra.mrb[14].mxu1 %vm1000_vm1, %v593_v18  ;;  %v2753_v11 = vpop.permute.xlu1 %727 }
 0x1fd   : > { %2011 = vmatprep.mubr.msk.f32.mxu0 %vm1000_vm1, %v560_v19  ;;  %2062 = vmatprep.mubr.msk.f32.mxu1 %vm1000_vm1, %v594_v20  ;;  %v2755_v12 = vpop.permute.xlu0 %722 }
 0x200   : > { %2012 = vmatmul.mubr.msk.f32.gmra.mrb[24].mxu0 %vm1000_vm1, %v561_v21  ;;  %2063 = vmatmul.mubr.msk.f32.gmra.mrb[16].mxu1 %vm1000_vm1, %v595_v22  ;;  %v2757_v13 = vpop.permute.xlu1 %737 }
 0x201   : > { %2014 = vmatprep.mubr.msk.f32.mxu0 %vm1000_vm1, %v562_v23  ;;  %2065 = vmatprep.mubr.msk.f32.mxu1 %vm1000_vm1, %v596_v24  ;;  %v2759_v14 = vpop.permute.xlu0 %732 }
 0x204   : > { %2015 = vmatmul.mubr.msk.f32.gmra.mrb[26].mxu0 %vm1000_vm1, %v563_v25  ;;  %2066 = vmatmul.mubr.msk.f32.gmra.mrb[18].mxu1 %vm1000_vm1, %v597_v26  ;;  %v2761_v15 = vpop.permute.xlu1 %747 }
 0x205   : > { %2017 = vmatprep.mubr.msk.f32.mxu0 %vm1000_vm1, %v564_v27  ;;  %2068 = vmatprep.mubr.msk.f32.mxu1 %vm1000_vm1, %v598_v28  ;;  %v2763_v16 = vpop.permute.xlu0 %742 }
 0x208   : > { %2018 = vmatmul.mubr.msk.f32.gmra.mrb[28].mxu0 %vm1000_vm1, %v565_v29  ;;  %2069 = vmatmul.mubr.msk.f32.gmra.mrb[20].mxu1 %vm1000_vm1, %v599_v30  ;;  %v2765_v17 = vpop.permute.xlu1 %757 }
 0x209   : > { %2020 = vmatprep.mubr.msk.f32.mxu0 %vm1000_vm1, %v566_v31  ;;  %2071 = vmatprep.mubr.msk.f32.mxu1 %vm1000_vm1, %v600_v32  ;;  %v2767_v18 = vpop.permute.xlu0 %752 }
 0x20c   : > { %2021 = vmatmul.mubr.msk.f32.gmra.mrb[30].mxu0 %vm1000_vm1, %v567_v33  ;;  %2072 = vmatmul.mubr.msk.f32.gmra.mrb[22].mxu1 %vm1000_vm1, %v601_v34  ;;  %v2769_v19 = vpop.permute.xlu1 %767 }
 0x20d   : > { %2023 = vmatprep.mubr.msk.f32.mxu0 %vm1000_vm1, %v568_v35  ;;  %2074 = vmatprep.mubr.msk.f32.mxu1 %vm1000_vm1, %v602_v36  ;;  %v2771_v20 = vpop.permute.xlu0 %762 }
 0x210   : > { %2024 = vmatmul.mubr.msk.f32.gmra.mrb[32].mxu0 %vm1000_vm1, %v569_v37  ;;  %2075 = vmatmul.mubr.msk.f32.gmra.mrb[24].mxu1 %vm1000_vm1, %v603_v38  ;;  %v2773_v21 = vpop.permute.xlu1 %777 }
 0x211   : > { %2026 = vmatprep.mubr.msk.f32.mxu0 %vm1000_vm1, %v570_v39  ;;  %2077 = vmatprep.mubr.msk.f32.mxu1 %vm1000_vm1, %v604_v40  ;;  %v2775_v22 = vpop.permute.xlu0 %772 }
 0x214   : > { %2027 = vmatmul.mubr.msk.f32.gmra.mrb[34].mxu0 %vm1000_vm1, %v571_v41  ;;  %2078 = vmatmul.mubr.msk.f32.gmra.mrb[26].mxu1 %vm1000_vm1, %v605_v42  ;;  %v2777_v23 = vpop.permute.xlu1 %787 }
 0x215   : > { %2029 = vmatprep.mubr.msk.f32.mxu0 %vm1000_vm1, %v572_v43  ;;  %2080 = vmatprep.mubr.msk.f32.mxu1 %vm1000_vm1, %v606_v44  ;;  %v2779_v24 = vpop.permute.xlu0 %782 }
 0x218   : > { %2030 = vmatmul.mubr.msk.f32.gmra.mrb[36].mxu0 %vm1000_vm1, %v573_v45  ;;  %2081 = vmatmul.mubr.msk.f32.gmra.mrb[28].mxu1 %vm1000_vm1, %v607_v46  ;;  %v2781_v25 = vpop.permute.xlu1 %797 }
 0x219   : > { %2032 = vmatprep.mubr.msk.f32.mxu0 %vm1000_vm1, %v574_v47  ;;  %2083 = vmatprep.mubr.msk.f32.mxu1 %vm1000_vm1, %v608_v48  ;;  %v2783_v26 = vpop.permute.xlu0 %792 }
 0x21c   : > { %2033 = vmatmul.mubr.msk.f32.gmra.mrb[38].mxu0 %vm1000_vm1, %v575_v49  ;;  %2084 = vmatmul.mubr.msk.f32.gmra.mrb[30].mxu1 %vm1000_vm1, %v609_v50  ;;  %v2785_v27 = vpop.permute.xlu1 %807 }
 0x21d   : > { %2035 = vmatprep.mubr.msk.f32.mxu0 %vm1000_vm1, %v576_v51  ;;  %2086 = vmatprep.mubr.msk.f32.mxu1 %vm1000_vm1, %v610_v52  ;;  %v2787_v28 = vpop.permute.xlu0 %802 }
 0x220   : > { %2036 = vmatmul.mubr.msk.f32.gmra.mrb[40].mxu0 %vm1000_vm1, %v577_v53  ;;  %2087 = vmatmul.mubr.msk.f32.gmra.mrb[32].mxu1 %vm1000_vm1, %v611_v54  ;;  %v2789_v29 = vpop.permute.xlu1 %817 }
 0x221   : > { %2038 = vmatprep.mubr.msk.f32.mxu0 %vm1000_vm1, %v578_v55  ;;  %2089 = vmatprep.mubr.msk.f32.mxu1 %vm1000_vm1, %v612_v56  ;;  %v2791_v30 = vpop.permute.xlu0 %812 }
 0x224   : > { %2039 = vmatmul.mubr.msk.f32.gmra.mrb[42].mxu0 %vm1000_vm1, %v579_v57  ;;  %2090 = vmatmul.mubr.msk.f32.gmra.mrb[34].mxu1 %vm1000_vm1, %v613_v58  ;;  %v2793_v31 = vpop.permute.xlu1 %827 }
 0x225   : > { %2041 = vmatprep.mubr.msk.f32.mxu0 %vm1000_vm1, %v580_v59  ;;  %2092 = vmatprep.mubr.msk.f32.mxu1 %vm1000_vm1, %v614_v60  ;;  %v2795_v32 = vpop.permute.xlu0 %822 }
 0x228   : > { %2042 = vmatmul.mubr.msk.f32.gmra.mrb[44].mxu0 %vm1000_vm1, %v581_v61  ;;  %2093 = vmatmul.mubr.msk.f32.gmra.mrb[36].mxu1 %vm1000_vm1, %v615_v62  ;;  %v2797_v33 = vpop.permute.xlu1 %837 }
 0x229   : > { %2044 = vmatprep.mubr.msk.f32.mxu0 %vm1000_vm1, %v582_v63  ;;  %v2799_v34 = vpop.permute.xlu0 %832 }
 0x22c   : > { %2045 = vmatmul.mubr.msk.f32.gmra.mrb[46].mxu0 %vm1000_vm1, %v583_v0  ;;  %v2801_v35 = vpop.permute.xlu1 %847 }
 0x22d   : > { %2047 = vmatprep.mubr.msk.f32.mxu0 %vm1000_vm1, %v584_v1  ;;  %v2803_v36 = vpop.permute.xlu0 %842 }
 0x230   : > { %2048 = vmatmul.mubr.msk.f32.gmra.mrb[48].mxu0 %vm1000_vm1, %v585_v2  ;;  %v858_v37 = vpop.permute.xlu1 %857 }
 0x231   : > { %v853_v38 = vpop.permute.xlu0 %852 }
 0x234   : > { %v868_v39 = vpop.permute.xlu1 %867 }
 0x235   : > { %v863_v40 = vpop.permute.xlu0 %862 }
 0x238   : > { %v878_v41 = vpop.permute.xlu1 %877 }
 0x239   : > { %v873_v42 = vpop.permute.xlu0 %872 }
 0x23c   : > { %v888_v43 = vpop.permute.xlu1 %887 }
 0x23d   : > { %v883_v44 = vpop.permute.xlu0 %882 }
 0x240   : > { %v2805_v45 = vpop.permute.xlu1 %897 }
 0x241   : > { %v2807_v46 = vpop.permute.xlu0 %892 }
 0x244   : > { %v2809_v47 = vpop.permute.xlu1 %907 }
 0x245   : > { %v2811_v48 = vpop.permute.xlu0 %902 }
 0x248   : > { %v2813_v49 = vpop.permute.xlu1 %917 }
 0x249   : > { %v2815_v50 = vpop.permute.xlu0 %912 }
 0x24c   : > { %v2818_v51 = vpop.permute.xlu1 %927 }
 0x24d   : > { %v2820_v52 = vpop.permute.xlu0 %922 }
 0x2c3   : > { %v2001_v53 = vpop.f32.mrb[16].mxu0  ;;  %v2052_v54 = vpop.f32.mrb[8].mxu1 }
 0x2c4   : > { %v1265_v55 = vadd.f32 %v2001_v53, %v688_v6  ;;  %v1435_v56 = vadd.f32 %v2052_v54, %v858_v37  ;;  %v1259_v57 = vpop.f32.mrb[17].mxu0  ;;  %v1429_v58 = vpop.f32.mrb[9].mxu1 }
 0x2c5   : > { %v1260_v59 = vadd.f32 %v1259_v57, %v683_v4  ;;  %v1430_v60 = vadd.f32 %v1429_v58, %v853_v38  ;;  %v2837_v37 = vpop.permute.xlu1 %937  ;;  %v2839_v38 = vpop.permute.xlu0 %932 }
 0x2c6   : > { %1580 = vst.msk [vmem:[%s2825_s6 + $0x8] sm:$0xff] %vm1578_vm2, %v1265_v55  ;;  %1614 = vst.msk [vmem:[%s2825_s6 + $0x118] sm:$0xff] %vm1578_vm2, %v1435_v56 }
 0x2c7   : > { %1579 = vst.msk [vmem:[%s2825_s6] sm:$0xff] %vm1578_vm2, %v1260_v59  ;;  %1613 = vst.msk [vmem:[%s2825_s6 + $0x110] sm:$0xff] %vm1578_vm2, %v1430_v60  ;;  %v2004_v61 = vpop.f32.mrb[18].mxu0  ;;  %v2055_v62 = vpop.f32.mrb[10].mxu1 }
 0x2c8   : > { %v1275_v63 = vadd.f32 %v2004_v61, %v2743_v5  ;;  %v1445_v0 = vadd.f32 %v2055_v62, %v868_v39  ;;  %v1269_v1 = vpop.f32.mrb[19].mxu0  ;;  %v1439_v2 = vpop.f32.mrb[11].mxu1 }
 0x2c9   : > { %v1270_v4 = vadd.f32 %v1269_v1, %v2741_v3  ;;  %v1440_v6 = vadd.f32 %v1439_v2, %v863_v40  ;;  %v2861_v61 = vpop.permute.xlu1 %947  ;;  %v2863_v62 = vpop.permute.xlu0 %942 }
 0x2ca   : > { %1582 = vst.msk [vmem:[%s2825_s6 + $0x18] sm:$0xff] %vm1578_vm2, %v1275_v63  ;;  %1616 = vst.msk [vmem:[%s2825_s6 + $0x128] sm:$0xff] %vm1578_vm2, %v1445_v0 }
 0x2cb   : > { %1581 = vst.msk [vmem:[%s2825_s6 + $0x10] sm:$0xff] %vm1578_vm2, %v1270_v4  ;;  %1615 = vst.msk [vmem:[%s2825_s6 + $0x120] sm:$0xff] %vm1578_vm2, %v1440_v6  ;;  %v2007_v5 = vpop.f32.mrb[20].mxu0  ;;  %v2058_v39 = vpop.f32.mrb[12].mxu1 }
 0x2cc   : > { %v1285_v3 = vadd.f32 %v2007_v5, %v2745_v7  ;;  %v1455_v40 = vadd.f32 %v2058_v39, %v878_v41  ;;  %v1279_v53 = vpop.f32.mrb[21].mxu0  ;;  %v1449_v54 = vpop.f32.mrb[13].mxu1 }
 0x2cd   : > { %v1280_v55 = vadd.f32 %v1279_v53, %v2747_v8  ;;  %v1450_v56 = vadd.f32 %v1449_v54, %v873_v42 }
 0x2ce   : > { %1584 = vst.msk [vmem:[%s2825_s6 + $0x28] sm:$0xff] %vm1578_vm2, %v1285_v3  ;;  %1618 = vst.msk [vmem:[%s2825_s6 + $0x138] sm:$0xff] %vm1578_vm2, %v1455_v40  ;;  %v958_v3 = vpop.permute.xlu1 %957  ;;  %v2889_v40 = vpop.permute.xlu0 %952 }
 0x2cf   : > { %1583 = vst.msk [vmem:[%s2825_s6 + $0x20] sm:$0xff] %vm1578_vm2, %v1280_v55  ;;  %1617 = vst.msk [vmem:[%s2825_s6 + $0x130] sm:$0xff] %vm1578_vm2, %v1450_v56  ;;  %v2010_v57 = vpop.f32.mrb[22].mxu0  ;;  %v2061_v7 = vpop.f32.mrb[14].mxu1 }
 0x2d0   : > { %v1295_v41 = vadd.f32 %v2010_v57, %v2749_v9  ;;  %v1465_v58 = vadd.f32 %v2061_v7, %v888_v43  ;;  %v1289_v59 = vpop.f32.mrb[23].mxu0  ;;  %v1459_v8 = vpop.f32.mrb[15].mxu1 }
 0x2d1   : > { %v1290_v42 = vadd.f32 %v1289_v59, %v2751_v10  ;;  %v1460_v60 = vadd.f32 %v1459_v8, %v883_v44 }
 0x2d2   : > { %1586 = vst.msk [vmem:[%s2825_s6 + $0x38] sm:$0xff] %vm1578_vm2, %v1295_v41  ;;  %1620 = vst.msk [vmem:[%s2825_s6 + $0x148] sm:$0xff] %vm1578_vm2, %v1465_v58  ;;  %v968_v59 = vpop.permute.xlu1 %967  ;;  %v963_v8 = vpop.permute.xlu0 %962 }
 0x2d3   : > { %1585 = vst.msk [vmem:[%s2825_s6 + $0x30] sm:$0xff] %vm1578_vm2, %v1290_v42  ;;  %1619 = vst.msk [vmem:[%s2825_s6 + $0x140] sm:$0xff] %vm1578_vm2, %v1460_v60  ;;  %v2013_v9 = vpop.f32.mrb[24].mxu0  ;;  %v2064_v43 = vpop.f32.mrb[16].mxu1 }
 0x2d4   : > { %v1305_v10 = vadd.f32 %v2013_v9, %v2753_v11  ;;  %v1475_v44 = vadd.f32 %v2064_v43, %v2805_v45  ;;  %v1299_v63 = vpop.f32.mrb[25].mxu0  ;;  %v1469_v0 = vpop.f32.mrb[17].mxu1 }
 0x2d5   : > { %v1300_v1 = vadd.f32 %v1299_v63, %v2755_v12  ;;  %v1470_v2 = vadd.f32 %v1469_v0, %v2807_v46 }
 0x2d6   : > { %1588 = vst.msk [vmem:[%s2825_s6 + $0x48] sm:$0xff] %vm1578_vm2, %v1305_v10  ;;  %1622 = vst.msk [vmem:[%s2825_s6 + $0x158] sm:$0xff] %vm1578_vm2, %v1475_v44 }
 0x2d7   : > { %1587 = vst.msk [vmem:[%s2825_s6 + $0x40] sm:$0xff] %vm1578_vm2, %v1300_v1  ;;  %1621 = vst.msk [vmem:[%s2825_s6 + $0x150] sm:$0xff] %vm1578_vm2, %v1470_v2  ;;  %v2016_v11 = vpop.f32.mrb[26].mxu0  ;;  %v2067_v45 = vpop.f32.mrb[18].mxu1 }
 0x2d8   : > { %v1315_v4 = vadd.f32 %v2016_v11, %v2757_v13  ;;  %v1485_v12 = vadd.f32 %v2067_v45, %v2809_v47  ;;  %v1309_v6 = vpop.f32.mrb[27].mxu0  ;;  %v1479_v5 = vpop.f32.mrb[19].mxu1 }
 0x2d9   : > { %v1310_v46 = vadd.f32 %v1309_v6, %v2759_v14  ;;  %v1480_v39 = vadd.f32 %v1479_v5, %v2811_v48  ;;  %v978_v1 = vpop.permute.xlu1 %977  ;;  %v973_v2 = vpop.permute.xlu0 %972 }
 0x2da   : > { %1590 = vst.msk [vmem:[%s2825_s6 + $0x58] sm:$0xff] %vm1578_vm2, %v1315_v4  ;;  %1624 = vst.msk [vmem:[%s2825_s6 + $0x168] sm:$0xff] %vm1578_vm2, %v1485_v12 }
 0x2db   : > { %1589 = vst.msk [vmem:[%s2825_s6 + $0x50] sm:$0xff] %vm1578_vm2, %v1310_v46  ;;  %1623 = vst.msk [vmem:[%s2825_s6 + $0x160] sm:$0xff] %vm1578_vm2, %v1480_v39  ;;  %v2019_v13 = vpop.f32.mrb[28].mxu0  ;;  %v2070_v47 = vpop.f32.mrb[20].mxu1 }
 0x2dc   : > { %v1325_v14 = vadd.f32 %v2019_v13, %v2761_v15  ;;  %v1495_v48 = vadd.f32 %v2070_v47, %v2813_v49  ;;  %v1319_v53 = vpop.f32.mrb[29].mxu0  ;;  %v1489_v54 = vpop.f32.mrb[21].mxu1 }
 0x2dd   : > { %v1320_v55 = vadd.f32 %v1319_v53, %v2763_v16  ;;  %v1490_v56 = vadd.f32 %v1489_v54, %v2815_v50  ;;  %v988_v13 = vpop.permute.xlu1 %987  ;;  %v983_v47 = vpop.permute.xlu0 %982 }
 0x2de   : > { %1592 = vst.msk [vmem:[%s2825_s6 + $0x68] sm:$0xff] %vm1578_vm2, %v1325_v14  ;;  %1626 = vst.msk [vmem:[%s2825_s6 + $0x178] sm:$0xff] %vm1578_vm2, %v1495_v48 }
 0x2df   : > { %1591 = vst.msk [vmem:[%s2825_s6 + $0x60] sm:$0xff] %vm1578_vm2, %v1320_v55  ;;  %1625 = vst.msk [vmem:[%s2825_s6 + $0x170] sm:$0xff] %vm1578_vm2, %v1490_v56  ;;  %v2022_v15 = vpop.f32.mrb[30].mxu0  ;;  %v2073_v49 = vpop.f32.mrb[22].mxu1 }
 0x2e0   : > { %v1335_v57 = vadd.f32 %v2022_v15, %v2765_v17  ;;  %v1505_v16 = vadd.f32 %v2073_v49, %v2818_v51  ;;  %v1329_v7 = vpop.f32.mrb[31].mxu0  ;;  %v1499_v41 = vpop.f32.mrb[23].mxu1 }
 0x2e1   : > { %v1330_v50 = vadd.f32 %v1329_v7, %v2767_v18  ;;  %v1500_v58 = vadd.f32 %v1499_v41, %v2820_v52 }
 0x2e2   : > { %1594 = vst.msk [vmem:[%s2825_s6 + $0x78] sm:$0xff] %vm1578_vm2, %v1335_v57  ;;  %1628 = vst.msk [vmem:[%s2825_s6 + $0x188] sm:$0xff] %vm1578_vm2, %v1505_v16 }
 0x2e3   : > { %1593 = vst.msk [vmem:[%s2825_s6 + $0x70] sm:$0xff] %vm1578_vm2, %v1330_v50  ;;  %1627 = vst.msk [vmem:[%s2825_s6 + $0x180] sm:$0xff] %vm1578_vm2, %v1500_v58  ;;  %v2025_v17 = vpop.f32.mrb[32].mxu0  ;;  %v2076_v51 = vpop.f32.mrb[24].mxu1 }
 0x2e4   : > { %v1345_v18 = vadd.f32 %v2025_v17, %v2769_v19  ;;  %v1515_v42 = vadd.f32 %v2076_v51, %v2837_v37  ;;  %v1339_v52 = vpop.f32.mrb[33].mxu0  ;;  %v1509_v60 = vpop.f32.mrb[25].mxu1 }
 0x2e5   : > { %v1340_v9 = vadd.f32 %v1339_v52, %v2771_v20  ;;  %v1510_v43 = vadd.f32 %v1509_v60, %v2839_v38  ;;  %v998_v50 = vpop.permute.xlu1 %997  ;;  %v993_v58 = vpop.permute.xlu0 %992 }
 0x2e6   : > { %1596 = vst.msk [vmem:[%s2825_s6 + $0x88] sm:$0xff] %vm1578_vm2, %v1345_v18  ;;  %1630 = vst.msk [vmem:[%s2825_s6 + $0x198] sm:$0xff] %vm1578_vm2, %v1515_v42 }
 0x2e7   : > { %1595 = vst.msk [vmem:[%s2825_s6 + $0x80] sm:$0xff] %vm1578_vm2, %v1340_v9  ;;  %1629 = vst.msk [vmem:[%s2825_s6 + $0x190] sm:$0xff] %vm1578_vm2, %v1510_v43  ;;  %v2028_v19 = vpop.f32.mrb[34].mxu0  ;;  %v2079_v37 = vpop.f32.mrb[26].mxu1 }
 0x2e8   : > { %v1355_v10 = vadd.f32 %v2028_v19, %v2773_v21  ;;  %v1525_v20 = vadd.f32 %v2079_v37, %v2861_v61  ;;  %v1349_v44 = vpop.f32.mrb[35].mxu0  ;;  %v1519_v63 = vpop.f32.mrb[27].mxu1 }
 0x2e9   : > { %v1350_v38 = vadd.f32 %v1349_v44, %v2775_v22  ;;  %v1520_v0 = vadd.f32 %v1519_v63, %v2863_v62 }
 0x2ea   : > { %1598 = vst.msk [vmem:[%s2825_s6 + $0x98] sm:$0xff] %vm1578_vm2, %v1355_v10  ;;  %1632 = vst.msk [vmem:[%s2825_s6 + $0x1a8] sm:$0xff] %vm1578_vm2, %v1525_v20 }
 0x2eb   : > { %1597 = vst.msk [vmem:[%s2825_s6 + $0x90] sm:$0xff] %vm1578_vm2, %v1350_v38  ;;  %1631 = vst.msk [vmem:[%s2825_s6 + $0x1a0] sm:$0xff] %vm1578_vm2, %v1520_v0  ;;  %v2031_v21 = vpop.f32.mrb[36].mxu0  ;;  %v2082_v61 = vpop.f32.mrb[28].mxu1 }
 0x2ec   : > { %v1365_v22 = vadd.f32 %v2031_v21, %v2777_v23  ;;  %v1535_v11 = vadd.f32 %v2082_v61, %v958_v3  ;;  %v1359_v45 = vpop.f32.mrb[37].mxu0  ;;  %v1529_v62 = vpop.f32.mrb[29].mxu1 }
 0x2ed   : > { %v1360_v4 = vadd.f32 %v1359_v45, %v2779_v24  ;;  %v1530_v12 = vadd.f32 %v1529_v62, %v2889_v40 }
 0x2ee   : > { %1600 = vst.msk [vmem:[%s2825_s6 + $0xa8] sm:$0xff] %vm1578_vm2, %v1365_v22  ;;  %1634 = vst.msk [vmem:[%s2825_s6 + $0x1b8] sm:$0xff] %vm1578_vm2, %v1535_v11 }
 0x2ef   : > { %1599 = vst.msk [vmem:[%s2825_s6 + $0xa0] sm:$0xff] %vm1578_vm2, %v1360_v4  ;;  %1633 = vst.msk [vmem:[%s2825_s6 + $0x1b0] sm:$0xff] %vm1578_vm2, %v1530_v12  ;;  %v2034_v23 = vpop.f32.mrb[38].mxu0  ;;  %v2085_v6 = vpop.f32.mrb[30].mxu1 }
 0x2f0   : > { %v1375_v5 = vadd.f32 %v2034_v23, %v2781_v25  ;;  %v1545_v46 = vadd.f32 %v2085_v6, %v968_v59  ;;  %v1369_v24 = vpop.f32.mrb[39].mxu0  ;;  %v1539_v39 = vpop.f32.mrb[31].mxu1 }
 0x2f1   : > { %v1370_v3 = vadd.f32 %v1369_v24, %v2783_v26  ;;  %v1540_v40 = vadd.f32 %v1539_v39, %v963_v8 }
 0x2f2   : > { %1602 = vst.msk [vmem:[%s2825_s6 + $0xb8] sm:$0xff] %vm1578_vm2, %v1375_v5  ;;  %1636 = vst.msk [vmem:[%s2825_s6 + $0x1c8] sm:$0xff] %vm1578_vm2, %v1545_v46 }
 0x2f3   : > { %1601 = vst.msk [vmem:[%s2825_s6 + $0xb0] sm:$0xff] %vm1578_vm2, %v1370_v3  ;;  %1635 = vst.msk [vmem:[%s2825_s6 + $0x1c0] sm:$0xff] %vm1578_vm2, %v1540_v40  ;;  %v2037_v25 = vpop.f32.mrb[40].mxu0  ;;  %v2088_v14 = vpop.f32.mrb[32].mxu1 }
 0x2f4   : > { %v1385_v48 = vadd.f32 %v2037_v25, %v2785_v27  ;;  %v1555_v26 = vadd.f32 %v2088_v14, %v978_v1  ;;  %v1379_v53 = vpop.f32.mrb[41].mxu0  ;;  %v1549_v54 = vpop.f32.mrb[33].mxu1 }
 0x2f5   : > { %v1380_v55 = vadd.f32 %v1379_v53, %v2787_v28  ;;  %v1550_v56 = vadd.f32 %v1549_v54, %v973_v2 }
 0x2f6   : > { %1604 = vst.msk [vmem:[%s2825_s6 + $0xc8] sm:$0xff] %vm1578_vm2, %v1385_v48  ;;  %1638 = vst.msk [vmem:[%s2825_s6 + $0x1d8] sm:$0xff] %vm1578_vm2, %v1555_v26 }
 0x2f7   : > { %1603 = vst.msk [vmem:[%s2825_s6 + $0xc0] sm:$0xff] %vm1578_vm2, %v1380_v55  ;;  %1637 = vst.msk [vmem:[%s2825_s6 + $0x1d0] sm:$0xff] %vm1578_vm2, %v1550_v56  ;;  %v2040_v15 = vpop.f32.mrb[42].mxu0  ;;  %v2091_v27 = vpop.f32.mrb[34].mxu1 }
 0x2f8   : > { %v1395_v49 = vadd.f32 %v2040_v15, %v2789_v29  ;;  %v1565_v57 = vadd.f32 %v2091_v27, %v988_v13  ;;  %v1389_v16 = vpop.f32.mrb[43].mxu0  ;;  %v1559_v28 = vpop.f32.mrb[35].mxu1 }
 0x2f9   : > { %v1390_v7 = vadd.f32 %v1389_v16, %v2791_v30  ;;  %v1560_v41 = vadd.f32 %v1559_v28, %v983_v47 }
 0x2fa   : > { %1606 = vst.msk [vmem:[%s2825_s6 + $0xd8] sm:$0xff] %vm1578_vm2, %v1395_v49  ;;  %1640 = vst.msk [vmem:[%s2825_s6 + $0x1e8] sm:$0xff] %vm1578_vm2, %v1565_v57 }
 0x2fb   : > { %1605 = vst.msk [vmem:[%s2825_s6 + $0xd0] sm:$0xff] %vm1578_vm2, %v1390_v7  ;;  %1639 = vst.msk [vmem:[%s2825_s6 + $0x1e0] sm:$0xff] %vm1578_vm2, %v1560_v41  ;;  %v2043_v29 = vpop.f32.mrb[44].mxu0  ;;  %v2094_v59 = vpop.f32.mrb[36].mxu1 }
 0x2fc   : > { %v1405_v30 = vadd.f32 %v2043_v29, %v2793_v31  ;;  %v1575_v8 = vadd.f32 %v2094_v59, %v998_v50  ;;  %v1399_v17 = vpop.f32.mrb[45].mxu0  ;;  %v1569_v51 = vpop.f32.mrb[37].mxu1 }
 0x2fd   : > { %v1400_v18 = vadd.f32 %v1399_v17, %v2795_v32  ;;  %v1570_v42 = vadd.f32 %v1569_v51, %v993_v58 }
 0x2fe   : > { %1608 = vst.msk [vmem:[%s2825_s6 + $0xe8] sm:$0xff] %vm1578_vm2, %v1405_v30  ;;  %1642 = vst.msk [vmem:[%s2825_s6 + $0x1f8] sm:$0xff] %vm1578_vm2, %v1575_v8 }
 0x2ff   : > { %1607 = vst.msk [vmem:[%s2825_s6 + $0xe0] sm:$0xff] %vm1578_vm2, %v1400_v18  ;;  %1641 = vst.msk [vmem:[%s2825_s6 + $0x1f0] sm:$0xff] %vm1578_vm2, %v1570_v42  ;;  %v2046_v52 = vpop.f32.mrb[46].mxu0 }
 0x300   : > { %v1415_v60 = vadd.f32 %v2046_v52, %v2797_v33  ;;  %v1409_v31 = vpop.f32.mrb[47].mxu0 }
 0x301   : > { %v1410_v9 = vadd.f32 %v1409_v31, %v2799_v34 }
 0x302   : > { %1610 = vst.msk [vmem:[%s2825_s6 + $0xf8] sm:$0xff] %vm1578_vm2, %v1415_v60 }
 0x303   : > { %1609 = vst.msk [vmem:[%s2825_s6 + $0xf0] sm:$0xff] %vm1578_vm2, %v1410_v9  ;;  %v2049_v32 = vpop.f32.mrb[48].mxu0 }
 0x304   : > { %v1425_v43 = vadd.f32 %v2049_v32, %v2801_v35  ;;  %v1419_v19 = vpop.f32.mrb[49].mxu0 }
 0x305   : > { %v1420_v37 = vadd.f32 %v1419_v19, %v2803_v36 }
 0x306   : > { %1612 = vst.msk [vmem:[%s2825_s6 + $0x108] sm:$0xff] %vm1578_vm2, %v1425_v43 }
 0x307   : > { %1611 = vst.msk [vmem:[%s2825_s6 + $0x100] sm:$0xff] %vm1578_vm2, %v1420_v37 }
 0x308 PF: > { %s15_s18 = sadd.s32 1, %s2176_s18  }
 0x309   : > { %p12_p4 = scmp.ge.s32.totalorder %s15_s18, 4  }
 0x30b   :  { %14 = sbr.rel (!%p12_p4) target bundleno = 1 (0x1), region = 70 }

</bundles_post_ra>
